<compile_context>
chip_gen: v7x
topology: tpu7x:2x2x1
jax: 0.10.0
libtpu: 0.0.40
codegen_flags: <defaults>
</compile_context>

<pallas_src>
import jax
import jax.numpy as jnp
from jax.experimental import pallas as pl
from jax.experimental.pallas import tpu as pltpu

INPUT_DIM = 2
LATENT_DIM = 2
HIDDEN = 8
assert INPUT_DIM == 2 and LATENT_DIM == 2 and HIDDEN % 2 == 0

LANE = 128            # vreg lane width
SUBLANE = 8           # f32 vreg sublanes
PAD_SAMPLES = 512     # batch padding granularity (keeps rows 8-aligned)
MAX_TILE_ROWS = 2048  # rows (x 128 lanes) per grid step (~6 MiB dbl-buffered)
WT_ROWS = 48          # packed weight table rows (42 used, padded to 8-mult)

# offsets into the packed lane-vector weight table
_L1 = 0      # 4 planes x (self-coeff, partner-coeff, bias)  rows  0..11
_L2 = 12     # 4 planes x (same-parity, cross-parity)        rows 12..19
_B2 = 20     # layer-2 bias                                  row  20
_L3 = 21     # 4 planes x (self-coeff, partner-coeff, bias)  rows 21..32
_L4 = 33     # 4 planes x (same-parity, cross-parity)        rows 33..40
_B4 = 41     # layer-4 bias                                  row  41


def _round_up(a, b):
    return ((a + b - 1) // b) * b


def _ae_kernel(x_ref, wt_ref, xhat_ref, z_ref):
    """One batch tile of the 2-8-2-8-2 autoencoder.

    x_ref:    (TILE_ROWS, 128) f32.  Natural row-major view of x[(B,2)]:
              lane 2k holds x[b,0], lane 2k+1 holds x[b,1] (64 samples/row).
    wt_ref:   (48, 128) f32 packed lane-alternating weight/bias vectors.
    outputs:  z_ref / xhat_ref in the same interleaved layout as x, so the
              wrapper only needs free reshapes.
    """
    x = x_ref[...]
    wt = wt_ref[...]

    # --- convention-independent pair swap (partner lane = lane XOR 1) -------
    lane = jax.lax.broadcasted_iota(jnp.int32, (1, LANE), 1)
    partner = lane + 1 - 2 * (lane % 2)
    # True on lanes where roll(v, 1) carries the partner's value, whichever
    # rotation direction pltpu.roll implements.
    use_r1 = jnp.broadcast_to(pltpu.roll(lane, 1, axis=1) == partner, x.shape)

    def pairswap(v):  # v[..., l] -> v[..., l ^ 1]  (2 XLU rolls + 1 select)
        return jnp.where(use_r1, pltpu.roll(v, 1, axis=1),
                         pltpu.roll(v, LANE - 1, axis=1))

    xp = pairswap(x)  # other feature of the same sample, at every lane

    # --- encoder Linear(2, 8) + ReLU: hidden 2p on even lanes, 2p+1 on odd --
    h1 = []
    for p in range(HIDDEN // 2):
        a, b, c = wt[_L1 + 3 * p], wt[_L1 + 3 * p + 1], wt[_L1 + 3 * p + 2]
        h1.append(jnp.maximum(x * a + xp * b + c, 0.0))

    # --- encoder Linear(8, 2): same-parity sum + pair-swapped cross sum -----
    same = h1[0] * wt[_L2]
    cross = h1[0] * wt[_L2 + 1]
    for p in range(1, HIDDEN // 2):
        same = same + h1[p] * wt[_L2 + 2 * p]
        cross = cross + h1[p] * wt[_L2 + 2 * p + 1]
    z = same + pairswap(cross) + wt[_B2]          # interleaved (z0, z1, ...)
    zp = pairswap(z)

    # --- decoder Linear(2, 8) + ReLU ----------------------------------------
    h2 = []
    for p in range(HIDDEN // 2):
        a, b, c = wt[_L3 + 3 * p], wt[_L3 + 3 * p + 1], wt[_L3 + 3 * p + 2]
        h2.append(jnp.maximum(z * a + zp * b + c, 0.0))

    # --- decoder Linear(8, 2) -----------------------------------------------
    same = h2[0] * wt[_L4]
    cross = h2[0] * wt[_L4 + 1]
    for p in range(1, HIDDEN // 2):
        same = same + h2[p] * wt[_L4 + 2 * p]
        cross = cross + h2[p] * wt[_L4 + 2 * p + 1]
    x_hat = same + pairswap(cross) + wt[_B4]

    # dense, unmasked full-lane stores
    z_ref[...] = z
    xhat_ref[...] = x_hat


def _pack_weight_table(p):
    """Pack all weights/biases as 42 lane-alternating (128,) vectors.

    Lane parity q = lane % 2 selects which member of a hidden-unit pair
    (2p for q=0, 2p+1 for q=1) / which feature column a lane works on, so
    every layer becomes a handful of full-width VPU FMAs in the kernel.
    """
    w1, b1, w2, b2 = p["w1"], p["b1"], p["w2"], p["b2"]
    w3, b3, w4, b4 = p["w3"], p["b3"], p["w4"], p["b4"]
    q = jnp.arange(LANE) % 2

    def alt(even_val, odd_val):
        return jnp.where(q == 0, even_val, odd_val)

    rows = []
    for i in range(HIDDEN // 2):                       # Linear(2,8): rows 0..11
        rows += [alt(w1[0, 2 * i], w1[1, 2 * i + 1]),  # coeff of x[., q]
                 alt(w1[1, 2 * i], w1[0, 2 * i + 1]),  # coeff of x[., 1-q]
                 alt(b1[2 * i], b1[2 * i + 1])]
    for i in range(HIDDEN // 2):                       # Linear(8,2): rows 12..19
        rows += [alt(w2[2 * i, 0], w2[2 * i + 1, 1]),  # same-parity term
                 alt(w2[2 * i, 1], w2[2 * i + 1, 0])]  # cross-parity term
    rows += [alt(b2[0], b2[1])]                        # row 20
    for i in range(HIDDEN // 2):                       # Linear(2,8): rows 21..32
        rows += [alt(w3[0, 2 * i], w3[1, 2 * i + 1]),
                 alt(w3[1, 2 * i], w3[0, 2 * i + 1]),
                 alt(b3[2 * i], b3[2 * i + 1])]
    for i in range(HIDDEN // 2):                       # Linear(8,2): rows 33..40
        rows += [alt(w4[2 * i, 0], w4[2 * i + 1, 1]),
                 alt(w4[2 * i, 1], w4[2 * i + 1, 0])]
    rows += [alt(b4[0], b4[1])]                        # row 41
    tab = jnp.stack(rows).astype(jnp.float32)          # (42, 128)
    return jnp.pad(tab, ((0, WT_ROWS - tab.shape[0]), (0, 0)))


def _pick_tile_rows(rows):
    # >=2 grid steps whenever possible (v7x megacore), capped for VMEM.
    half = _round_up(pl.cdiv(rows, 2), SUBLANE)
    return max(SUBLANE, min(MAX_TILE_ROWS, half))


def autoencoder_forward(x, params):
    """x: (B, 2) float.  Returns (x_hat, z) like the PyTorch module."""
    B = x.shape[0]
    x = x.astype(jnp.float32)
    bp = _round_up(max(B, 1), PAD_SAMPLES)
    rows = (bp * INPUT_DIM) // LANE                 # multiple of SUBLANE

    flat = x.reshape(-1)                            # free (row-major view)
    if bp != B:                                     # copy only when padding
        flat = jnp.pad(flat, (0, INPUT_DIM * (bp - B)))
    x2d = flat.reshape(rows, LANE)                  # free

    wtab = _pack_weight_table(params)               # (48, 128), ~24 KiB

    tile_rows = _pick_tile_rows(rows)
    grid = (pl.cdiv(rows, tile_rows),)              # ragged final block masked

    tile_spec = pl.BlockSpec((tile_rows, LANE), lambda i: (i, 0))
    wt_spec = pl.BlockSpec((WT_ROWS, LANE), lambda i: (0, 0))  # fetched once

    flops = 2 * bp * (INPUT_DIM * HIDDEN + HIDDEN * LATENT_DIM
                      + LATENT_DIM * HIDDEN + HIDDEN * INPUT_DIM)
    bytes_accessed = 4 * bp * (2 * INPUT_DIM + LATENT_DIM)

    xhat2d, z2d = pl.pallas_call(
        _ae_kernel,
        grid=grid,
        in_specs=[tile_spec, wt_spec],
        out_specs=(tile_spec, tile_spec),
        out_shape=(
            jax.ShapeDtypeStruct((rows, LANE), jnp.float32),
            jax.ShapeDtypeStruct((rows, LANE), jnp.float32),
        ),
        compiler_params=pltpu.CompilerParams(
            dimension_semantics=("parallel",)),
        cost_estimate=pl.CostEstimate(
            flops=flops, transcendentals=0, bytes_accessed=bytes_accessed),
    )(x2d, wtab)

    x_hat = xhat2d.reshape(bp, INPUT_DIM)           # free
    z = z2d.reshape(bp, INPUT_DIM)                  # free
    if bp != B:
        x_hat, z = x_hat[:B], z[:B]
    return x_hat, z


def init_params(key):
    """PyTorch-style nn.Linear init: uniform(-1/sqrt(fan_in), 1/sqrt(fan_in)).
    Weights stored as (in_features, out_features); biases as (out_features,)."""
    ks = jax.random.split(key, 8)

    def lin(kw, kb, fan_in, fan_out):
        bound = 1.0 / float(fan_in) ** 0.5
        w = jax.random.uniform(kw, (fan_in, fan_out), jnp.float32, -bound, bound)
        b = jax.random.uniform(kb, (fan_out,), jnp.float32, -bound, bound)
        return w, b

    w1, b1 = lin(ks[0], ks[1], INPUT_DIM, HIDDEN)
    w2, b2 = lin(ks[2], ks[3], HIDDEN, LATENT_DIM)
    w3, b3 = lin(ks[4], ks[5], LATENT_DIM, HIDDEN)
    w4, b4 = lin(ks[6], ks[7], HIDDEN, INPUT_DIM)
    return dict(w1=w1, b1=b1, w2=w2, b2=b2, w3=w3, b3=b3, w4=w4, b4=b4)


def reference_forward(x, p):
    """Plain-JAX reference (full-precision dots match the f32 VPU math)."""
    hi = jax.lax.Precision.HIGHEST
    h1 = jnp.maximum(jnp.dot(x, p["w1"], precision=hi) + p["b1"], 0.0)
    z = jnp.dot(h1, p["w2"], precision=hi) + p["b2"]
    h2 = jnp.maximum(jnp.dot(z, p["w3"], precision=hi) + p["b3"], 0.0)
    x_hat = jnp.dot(h2, p["w4"], precision=hi) + p["b4"]
    return x_hat, z


if __name__ == "__main__":
    key = jax.random.PRNGKey(0)
    k_x, k_p = jax.random.split(key)
    params = init_params(k_p)

    fwd = jax.jit(autoencoder_forward)

    # small demo batch (shape matches the PyTorch module: (batch, input_dim))
    batch = 8
    x = jax.random.normal(k_x, (batch, INPUT_DIM), dtype=jnp.float32)
    x_hat, z = fwd(x, params)
    jax.block_until_ready((x_hat, z))

    x_hat_want, z_want = reference_forward(x, params)
    assert x_hat.shape == (batch, INPUT_DIM) and z.shape == (batch, LATENT_DIM)
    assert jnp.allclose(x_hat, x_hat_want, atol=1e-5, rtol=1e-5)
    assert jnp.allclose(z, z_want, atol=1e-5, rtol=1e-5)

    # larger batch: multi-step grid, megacore split, ragged final block,
    # pad/slice path (B not a multiple of 512).
    big = 200_000
    xb = jax.random.normal(jax.random.PRNGKey(1), (big, INPUT_DIM),
                           dtype=jnp.float32)
    xb_hat, zb = fwd(xb, params)
    jax.block_until_ready((xb_hat, zb))
    xb_hat_want, zb_want = reference_forward(xb, params)
    assert xb_hat.shape == (big, INPUT_DIM) and zb.shape == (big, LATENT_DIM)
    assert jnp.allclose(xb_hat, xb_hat_want, atol=1e-4, rtol=1e-4)
    assert jnp.allclose(zb, zb_want, atol=1e-4, rtol=1e-4)

    print("KERNEL_OK")
</pallas_src>

<mosaic_0001>
module attributes {stable_mosaic.version = 11 : i64} {
  func.func @_ae_kernel(%arg0: i32, %arg1: memref<8x128xf32, #tpu.memory_space<vmem>>, %arg2: memref<48x128xf32, #tpu.memory_space<vmem>>, %arg3: memref<8x128xf32, #tpu.memory_space<vmem>>, %arg4: memref<8x128xf32, #tpu.memory_space<vmem>>) attributes {dimension_semantics = [#tpu.dimension_semantics<parallel>], iteration_bounds = array<i64: 1>, scalar_prefetch = 0 : i64, scratch_operands = 0 : i64, tpu.core_type = #tpu.core_type<tc>, window_params = [{transform_indices = @transform_0, window_bounds = array<i64: 8, 128>}, {pipeline_mode = #tpu.pipeline_mode<synchronous>, transform_indices = @transform_1, window_bounds = array<i64: 48, 128>}, {transform_indices = @transform_2, window_bounds = array<i64: 8, 128>}, {transform_indices = @transform_3, window_bounds = array<i64: 8, 128>}]} {
    %c0 = arith.constant 0 : index
    %c0_0 = arith.constant 0 : index
    %0 = vector.load %arg1[%c0, %c0_0] : memref<8x128xf32, #tpu.memory_space<vmem>>, vector<8x128xf32>
    %c0_1 = arith.constant 0 : index
    %c0_2 = arith.constant 0 : index
    %1 = vector.load %arg2[%c0_1, %c0_2] : memref<48x128xf32, #tpu.memory_space<vmem>>, vector<48x128xf32>
    %2 = tpu.iota {dimensions = array<i32: 1>} : vector<1x128xi32>
    %c1_i32 = arith.constant 1 : i32
    %3 = vector.broadcast %c1_i32 : i32 to vector<1x128xi32>
    %4 = arith.addi %2, %3 : vector<1x128xi32>
    %c2_i32 = arith.constant 2 : i32
    %c0_i32 = arith.constant 0 : i32
    %5 = arith.cmpi eq, %c2_i32, %c0_i32 : i32
    %c1_i32_3 = arith.constant 1 : i32
    %6 = arith.select %5, %c1_i32_3, %c2_i32 : i32
    %7 = vector.broadcast %6 : i32 to vector<1x128xi32>
    %8 = arith.remsi %2, %7 : vector<1x128xi32>
    %c0_i32_4 = arith.constant 0 : i32
    %9 = vector.broadcast %c0_i32_4 : i32 to vector<1x128xi32>
    %10 = arith.cmpi ne, %8, %9 : vector<1x128xi32>
    %c0_i32_5 = arith.constant 0 : i32
    %11 = vector.broadcast %c0_i32_5 : i32 to vector<1x128xi32>
    %12 = arith.cmpi slt, %8, %11 : vector<1x128xi32>
    %c0_i32_6 = arith.constant 0 : i32
    %13 = arith.cmpi slt, %6, %c0_i32_6 : i32
    %14 = vector.broadcast %13 : i1 to vector<1x128xi1>
    %15 = vector.broadcast %14 : vector<1x128xi1> to vector<1x128xi1>
    %16 = arith.xori %12, %15 : vector<1x128xi1>
    %17 = arith.andi %16, %10 : vector<1x128xi1>
    %18 = vector.broadcast %6 : i32 to vector<1x128xi32>
    %19 = arith.addi %8, %18 : vector<1x128xi32>
    %20 = arith.select %17, %19, %8 : vector<1x128xi1>, vector<1x128xi32>
    %c2_i32_7 = arith.constant 2 : i32
    %21 = vector.broadcast %c2_i32_7 : i32 to vector<1x128xi32>
    %22 = arith.muli %21, %20 : vector<1x128xi32>
    %23 = arith.subi %4, %22 : vector<1x128xi32>
    %c1_i32_8 = arith.constant 1 : i32
    %24 = tpu.dynamic_rotate %2 by %c1_i32_8 dim 1 : vector<1x128xi32>, i32 -> vector<1x128xi32>
    %25 = arith.cmpi eq, %24, %23 : vector<1x128xi32>
    %26 = vector.shape_cast %25 : vector<1x128xi1> to vector<1x128xi1>
    %27 = vector.broadcast %26 : vector<1x128xi1> to vector<8x128xi1>
    %c1_i32_9 = arith.constant 1 : i32
    %28 = tpu.dynamic_rotate %0 by %c1_i32_9 dim 1 : vector<8x128xf32>, i32 -> vector<8x128xf32>
    %c127_i32 = arith.constant 127 : i32
    %29 = tpu.dynamic_rotate %0 by %c127_i32 dim 1 : vector<8x128xf32>, i32 -> vector<8x128xf32>
    %30 = arith.select %27, %28, %29 : vector<8x128xi1>, vector<8x128xf32>
    %31 = vector.extract_strided_slice %1 {offsets = [0, 0], sizes = [1, 128], strides = [1, 1]} : vector<48x128xf32> to vector<1x128xf32>
    %32 = vector.shape_cast %31 : vector<1x128xf32> to vector<128xf32>
    %33 = vector.extract_strided_slice %1 {offsets = [1, 0], sizes = [1, 128], strides = [1, 1]} : vector<48x128xf32> to vector<1x128xf32>
    %34 = vector.shape_cast %33 : vector<1x128xf32> to vector<128xf32>
    %35 = vector.extract_strided_slice %1 {offsets = [2, 0], sizes = [1, 128], strides = [1, 1]} : vector<48x128xf32> to vector<1x128xf32>
    %36 = vector.shape_cast %35 : vector<1x128xf32> to vector<128xf32>
    %37 = vector.shape_cast %32 : vector<128xf32> to vector<1x128xf32>
    %38 = vector.broadcast %37 : vector<1x128xf32> to vector<8x128xf32>
    %39 = arith.mulf %0, %38 : vector<8x128xf32>
    %40 = vector.shape_cast %34 : vector<128xf32> to vector<1x128xf32>
    %41 = vector.broadcast %40 : vector<1x128xf32> to vector<8x128xf32>
    %42 = arith.mulf %30, %41 : vector<8x128xf32>
    %43 = arith.addf %39, %42 : vector<8x128xf32>
    %44 = vector.shape_cast %36 : vector<128xf32> to vector<1x128xf32>
    %45 = vector.broadcast %44 : vector<1x128xf32> to vector<8x128xf32>
    %46 = arith.addf %43, %45 : vector<8x128xf32>
    %cst = arith.constant 0.000000e+00 : f32
    %47 = vector.broadcast %cst : f32 to vector<8x128xf32>
    %48 = arith.maximumf %46, %47 : vector<8x128xf32>
    %49 = vector.extract_strided_slice %1 {offsets = [3, 0], sizes = [1, 128], strides = [1, 1]} : vector<48x128xf32> to vector<1x128xf32>
    %50 = vector.shape_cast %49 : vector<1x128xf32> to vector<128xf32>
    %51 = vector.extract_strided_slice %1 {offsets = [4, 0], sizes = [1, 128], strides = [1, 1]} : vector<48x128xf32> to vector<1x128xf32>
    %52 = vector.shape_cast %51 : vector<1x128xf32> to vector<128xf32>
    %53 = vector.extract_strided_slice %1 {offsets = [5, 0], sizes = [1, 128], strides = [1, 1]} : vector<48x128xf32> to vector<1x128xf32>
    %54 = vector.shape_cast %53 : vector<1x128xf32> to vector<128xf32>
    %55 = vector.shape_cast %50 : vector<128xf32> to vector<1x128xf32>
    %56 = vector.broadcast %55 : vector<1x128xf32> to vector<8x128xf32>
    %57 = arith.mulf %0, %56 : vector<8x128xf32>
    %58 = vector.shape_cast %52 : vector<128xf32> to vector<1x128xf32>
    %59 = vector.broadcast %58 : vector<1x128xf32> to vector<8x128xf32>
    %60 = arith.mulf %30, %59 : vector<8x128xf32>
    %61 = arith.addf %57, %60 : vector<8x128xf32>
    %62 = vector.shape_cast %54 : vector<128xf32> to vector<1x128xf32>
    %63 = vector.broadcast %62 : vector<1x128xf32> to vector<8x128xf32>
    %64 = arith.addf %61, %63 : vector<8x128xf32>
    %cst_10 = arith.constant 0.000000e+00 : f32
    %65 = vector.broadcast %cst_10 : f32 to vector<8x128xf32>
    %66 = arith.maximumf %64, %65 : vector<8x128xf32>
    %67 = vector.extract_strided_slice %1 {offsets = [6, 0], sizes = [1, 128], strides = [1, 1]} : vector<48x128xf32> to vector<1x128xf32>
    %68 = vector.shape_cast %67 : vector<1x128xf32> to vector<128xf32>
    %69 = vector.extract_strided_slice %1 {offsets = [7, 0], sizes = [1, 128], strides = [1, 1]} : vector<48x128xf32> to vector<1x128xf32>
    %70 = vector.shape_cast %69 : vector<1x128xf32> to vector<128xf32>
    %71 = vector.extract_strided_slice %1 {offsets = [8, 0], sizes = [1, 128], strides = [1, 1]} : vector<48x128xf32> to vector<1x128xf32>
    %72 = vector.shape_cast %71 : vector<1x128xf32> to vector<128xf32>
    %73 = vector.shape_cast %68 : vector<128xf32> to vector<1x128xf32>
    %74 = vector.broadcast %73 : vector<1x128xf32> to vector<8x128xf32>
    %75 = arith.mulf %0, %74 : vector<8x128xf32>
    %76 = vector.shape_cast %70 : vector<128xf32> to vector<1x128xf32>
    %77 = vector.broadcast %76 : vector<1x128xf32> to vector<8x128xf32>
    %78 = arith.mulf %30, %77 : vector<8x128xf32>
    %79 = arith.addf %75, %78 : vector<8x128xf32>
    %80 = vector.shape_cast %72 : vector<128xf32> to vector<1x128xf32>
    %81 = vector.broadcast %80 : vector<1x128xf32> to vector<8x128xf32>
    %82 = arith.addf %79, %81 : vector<8x128xf32>
    %cst_11 = arith.constant 0.000000e+00 : f32
    %83 = vector.broadcast %cst_11 : f32 to vector<8x128xf32>
    %84 = arith.maximumf %82, %83 : vector<8x128xf32>
    %85 = vector.extract_strided_slice %1 {offsets = [9, 0], sizes = [1, 128], strides = [1, 1]} : vector<48x128xf32> to vector<1x128xf32>
    %86 = vector.shape_cast %85 : vector<1x128xf32> to vector<128xf32>
    %87 = vector.extract_strided_slice %1 {offsets = [10, 0], sizes = [1, 128], strides = [1, 1]} : vector<48x128xf32> to vector<1x128xf32>
    %88 = vector.shape_cast %87 : vector<1x128xf32> to vector<128xf32>
    %89 = vector.extract_strided_slice %1 {offsets = [11, 0], sizes = [1, 128], strides = [1, 1]} : vector<48x128xf32> to vector<1x128xf32>
    %90 = vector.shape_cast %89 : vector<1x128xf32> to vector<128xf32>
    %91 = vector.shape_cast %86 : vector<128xf32> to vector<1x128xf32>
    %92 = vector.broadcast %91 : vector<1x128xf32> to vector<8x128xf32>
    %93 = arith.mulf %0, %92 : vector<8x128xf32>
    %94 = vector.shape_cast %88 : vector<128xf32> to vector<1x128xf32>
    %95 = vector.broadcast %94 : vector<1x128xf32> to vector<8x128xf32>
    %96 = arith.mulf %30, %95 : vector<8x128xf32>
    %97 = arith.addf %93, %96 : vector<8x128xf32>
    %98 = vector.shape_cast %90 : vector<128xf32> to vector<1x128xf32>
    %99 = vector.broadcast %98 : vector<1x128xf32> to vector<8x128xf32>
    %100 = arith.addf %97, %99 : vector<8x128xf32>
    %cst_12 = arith.constant 0.000000e+00 : f32
    %101 = vector.broadcast %cst_12 : f32 to vector<8x128xf32>
    %102 = arith.maximumf %100, %101 : vector<8x128xf32>
    %103 = vector.extract_strided_slice %1 {offsets = [12, 0], sizes = [1, 128], strides = [1, 1]} : vector<48x128xf32> to vector<1x128xf32>
    %104 = vector.shape_cast %103 : vector<1x128xf32> to vector<128xf32>
    %105 = vector.shape_cast %104 : vector<128xf32> to vector<1x128xf32>
    %106 = vector.broadcast %105 : vector<1x128xf32> to vector<8x128xf32>
    %107 = arith.mulf %48, %106 : vector<8x128xf32>
    %108 = vector.extract_strided_slice %1 {offsets = [13, 0], sizes = [1, 128], strides = [1, 1]} : vector<48x128xf32> to vector<1x128xf32>
    %109 = vector.shape_cast %108 : vector<1x128xf32> to vector<128xf32>
    %110 = vector.shape_cast %109 : vector<128xf32> to vector<1x128xf32>
    %111 = vector.broadcast %110 : vector<1x128xf32> to vector<8x128xf32>
    %112 = arith.mulf %48, %111 : vector<8x128xf32>
    %113 = vector.extract_strided_slice %1 {offsets = [14, 0], sizes = [1, 128], strides = [1, 1]} : vector<48x128xf32> to vector<1x128xf32>
    %114 = vector.shape_cast %113 : vector<1x128xf32> to vector<128xf32>
    %115 = vector.shape_cast %114 : vector<128xf32> to vector<1x128xf32>
    %116 = vector.broadcast %115 : vector<1x128xf32> to vector<8x128xf32>
    %117 = arith.mulf %66, %116 : vector<8x128xf32>
    %118 = arith.addf %107, %117 : vector<8x128xf32>
    %119 = vector.extract_strided_slice %1 {offsets = [15, 0], sizes = [1, 128], strides = [1, 1]} : vector<48x128xf32> to vector<1x128xf32>
    %120 = vector.shape_cast %119 : vector<1x128xf32> to vector<128xf32>
    %121 = vector.shape_cast %120 : vector<128xf32> to vector<1x128xf32>
    %122 = vector.broadcast %121 : vector<1x128xf32> to vector<8x128xf32>
    %123 = arith.mulf %66, %122 : vector<8x128xf32>
    %124 = arith.addf %112, %123 : vector<8x128xf32>
    %125 = vector.extract_strided_slice %1 {offsets = [16, 0], sizes = [1, 128], strides = [1, 1]} : vector<48x128xf32> to vector<1x128xf32>
    %126 = vector.shape_cast %125 : vector<1x128xf32> to vector<128xf32>
    %127 = vector.shape_cast %126 : vector<128xf32> to vector<1x128xf32>
    %128 = vector.broadcast %127 : vector<1x128xf32> to vector<8x128xf32>
    %129 = arith.mulf %84, %128 : vector<8x128xf32>
    %130 = arith.addf %118, %129 : vector<8x128xf32>
    %131 = vector.extract_strided_slice %1 {offsets = [17, 0], sizes = [1, 128], strides = [1, 1]} : vector<48x128xf32> to vector<1x128xf32>
    %132 = vector.shape_cast %131 : vector<1x128xf32> to vector<128xf32>
    %133 = vector.shape_cast %132 : vector<128xf32> to vector<1x128xf32>
    %134 = vector.broadcast %133 : vector<1x128xf32> to vector<8x128xf32>
    %135 = arith.mulf %84, %134 : vector<8x128xf32>
    %136 = arith.addf %124, %135 : vector<8x128xf32>
    %137 = vector.extract_strided_slice %1 {offsets = [18, 0], sizes = [1, 128], strides = [1, 1]} : vector<48x128xf32> to vector<1x128xf32>
    %138 = vector.shape_cast %137 : vector<1x128xf32> to vector<128xf32>
    %139 = vector.shape_cast %138 : vector<128xf32> to vector<1x128xf32>
    %140 = vector.broadcast %139 : vector<1x128xf32> to vector<8x128xf32>
    %141 = arith.mulf %102, %140 : vector<8x128xf32>
    %142 = arith.addf %130, %141 : vector<8x128xf32>
    %143 = vector.extract_strided_slice %1 {offsets = [19, 0], sizes = [1, 128], strides = [1, 1]} : vector<48x128xf32> to vector<1x128xf32>
    %144 = vector.shape_cast %143 : vector<1x128xf32> to vector<128xf32>
    %145 = vector.shape_cast %144 : vector<128xf32> to vector<1x128xf32>
    %146 = vector.broadcast %145 : vector<1x128xf32> to vector<8x128xf32>
    %147 = arith.mulf %102, %146 : vector<8x128xf32>
    %148 = arith.addf %136, %147 : vector<8x128xf32>
    %c1_i32_13 = arith.constant 1 : i32
    %149 = tpu.dynamic_rotate %148 by %c1_i32_13 dim 1 : vector<8x128xf32>, i32 -> vector<8x128xf32>
    %c127_i32_14 = arith.constant 127 : i32
    %150 = tpu.dynamic_rotate %148 by %c127_i32_14 dim 1 : vector<8x128xf32>, i32 -> vector<8x128xf32>
    %151 = arith.select %27, %149, %150 : vector<8x128xi1>, vector<8x128xf32>
    %152 = arith.addf %142, %151 : vector<8x128xf32>
    %153 = vector.extract_strided_slice %1 {offsets = [20, 0], sizes = [1, 128], strides = [1, 1]} : vector<48x128xf32> to vector<1x128xf32>
    %154 = vector.shape_cast %153 : vector<1x128xf32> to vector<128xf32>
    %155 = vector.shape_cast %154 : vector<128xf32> to vector<1x128xf32>
    %156 = vector.broadcast %155 : vector<1x128xf32> to vector<8x128xf32>
    %157 = arith.addf %152, %156 : vector<8x128xf32>
    %c1_i32_15 = arith.constant 1 : i32
    %158 = tpu.dynamic_rotate %157 by %c1_i32_15 dim 1 : vector<8x128xf32>, i32 -> vector<8x128xf32>
    %c127_i32_16 = arith.constant 127 : i32
    %159 = tpu.dynamic_rotate %157 by %c127_i32_16 dim 1 : vector<8x128xf32>, i32 -> vector<8x128xf32>
    %160 = arith.select %27, %158, %159 : vector<8x128xi1>, vector<8x128xf32>
    %161 = vector.extract_strided_slice %1 {offsets = [21, 0], sizes = [1, 128], strides = [1, 1]} : vector<48x128xf32> to vector<1x128xf32>
    %162 = vector.shape_cast %161 : vector<1x128xf32> to vector<128xf32>
    %163 = vector.extract_strided_slice %1 {offsets = [22, 0], sizes = [1, 128], strides = [1, 1]} : vector<48x128xf32> to vector<1x128xf32>
    %164 = vector.shape_cast %163 : vector<1x128xf32> to vector<128xf32>
    %165 = vector.extract_strided_slice %1 {offsets = [23, 0], sizes = [1, 128], strides = [1, 1]} : vector<48x128xf32> to vector<1x128xf32>
    %166 = vector.shape_cast %165 : vector<1x128xf32> to vector<128xf32>
    %167 = vector.shape_cast %162 : vector<128xf32> to vector<1x128xf32>
    %168 = vector.broadcast %167 : vector<1x128xf32> to vector<8x128xf32>
    %169 = arith.mulf %157, %168 : vector<8x128xf32>
    %170 = vector.shape_cast %164 : vector<128xf32> to vector<1x128xf32>
    %171 = vector.broadcast %170 : vector<1x128xf32> to vector<8x128xf32>
    %172 = arith.mulf %160, %171 : vector<8x128xf32>
    %173 = arith.addf %169, %172 : vector<8x128xf32>
    %174 = vector.shape_cast %166 : vector<128xf32> to vector<1x128xf32>
    %175 = vector.broadcast %174 : vector<1x128xf32> to vector<8x128xf32>
    %176 = arith.addf %173, %175 : vector<8x128xf32>
    %cst_17 = arith.constant 0.000000e+00 : f32
    %177 = vector.broadcast %cst_17 : f32 to vector<8x128xf32>
    %178 = arith.maximumf %176, %177 : vector<8x128xf32>
    %179 = vector.extract_strided_slice %1 {offsets = [24, 0], sizes = [1, 128], strides = [1, 1]} : vector<48x128xf32> to vector<1x128xf32>
    %180 = vector.shape_cast %179 : vector<1x128xf32> to vector<128xf32>
    %181 = vector.extract_strided_slice %1 {offsets = [25, 0], sizes = [1, 128], strides = [1, 1]} : vector<48x128xf32> to vector<1x128xf32>
    %182 = vector.shape_cast %181 : vector<1x128xf32> to vector<128xf32>
    %183 = vector.extract_strided_slice %1 {offsets = [26, 0], sizes = [1, 128], strides = [1, 1]} : vector<48x128xf32> to vector<1x128xf32>
    %184 = vector.shape_cast %183 : vector<1x128xf32> to vector<128xf32>
    %185 = vector.shape_cast %180 : vector<128xf32> to vector<1x128xf32>
    %186 = vector.broadcast %185 : vector<1x128xf32> to vector<8x128xf32>
    %187 = arith.mulf %157, %186 : vector<8x128xf32>
    %188 = vector.shape_cast %182 : vector<128xf32> to vector<1x128xf32>
    %189 = vector.broadcast %188 : vector<1x128xf32> to vector<8x128xf32>
    %190 = arith.mulf %160, %189 : vector<8x128xf32>
    %191 = arith.addf %187, %190 : vector<8x128xf32>
    %192 = vector.shape_cast %184 : vector<128xf32> to vector<1x128xf32>
    %193 = vector.broadcast %192 : vector<1x128xf32> to vector<8x128xf32>
    %194 = arith.addf %191, %193 : vector<8x128xf32>
    %cst_18 = arith.constant 0.000000e+00 : f32
    %195 = vector.broadcast %cst_18 : f32 to vector<8x128xf32>
    %196 = arith.maximumf %194, %195 : vector<8x128xf32>
    %197 = vector.extract_strided_slice %1 {offsets = [27, 0], sizes = [1, 128], strides = [1, 1]} : vector<48x128xf32> to vector<1x128xf32>
    %198 = vector.shape_cast %197 : vector<1x128xf32> to vector<128xf32>
    %199 = vector.extract_strided_slice %1 {offsets = [28, 0], sizes = [1, 128], strides = [1, 1]} : vector<48x128xf32> to vector<1x128xf32>
    %200 = vector.shape_cast %199 : vector<1x128xf32> to vector<128xf32>
    %201 = vector.extract_strided_slice %1 {offsets = [29, 0], sizes = [1, 128], strides = [1, 1]} : vector<48x128xf32> to vector<1x128xf32>
    %202 = vector.shape_cast %201 : vector<1x128xf32> to vector<128xf32>
    %203 = vector.shape_cast %198 : vector<128xf32> to vector<1x128xf32>
    %204 = vector.broadcast %203 : vector<1x128xf32> to vector<8x128xf32>
    %205 = arith.mulf %157, %204 : vector<8x128xf32>
    %206 = vector.shape_cast %200 : vector<128xf32> to vector<1x128xf32>
    %207 = vector.broadcast %206 : vector<1x128xf32> to vector<8x128xf32>
    %208 = arith.mulf %160, %207 : vector<8x128xf32>
    %209 = arith.addf %205, %208 : vector<8x128xf32>
    %210 = vector.shape_cast %202 : vector<128xf32> to vector<1x128xf32>
    %211 = vector.broadcast %210 : vector<1x128xf32> to vector<8x128xf32>
    %212 = arith.addf %209, %211 : vector<8x128xf32>
    %cst_19 = arith.constant 0.000000e+00 : f32
    %213 = vector.broadcast %cst_19 : f32 to vector<8x128xf32>
    %214 = arith.maximumf %212, %213 : vector<8x128xf32>
    %215 = vector.extract_strided_slice %1 {offsets = [30, 0], sizes = [1, 128], strides = [1, 1]} : vector<48x128xf32> to vector<1x128xf32>
    %216 = vector.shape_cast %215 : vector<1x128xf32> to vector<128xf32>
    %217 = vector.extract_strided_slice %1 {offsets = [31, 0], sizes = [1, 128], strides = [1, 1]} : vector<48x128xf32> to vector<1x128xf32>
    %218 = vector.shape_cast %217 : vector<1x128xf32> to vector<128xf32>
    %219 = vector.extract_strided_slice %1 {offsets = [32, 0], sizes = [1, 128], strides = [1, 1]} : vector<48x128xf32> to vector<1x128xf32>
    %220 = vector.shape_cast %219 : vector<1x128xf32> to vector<128xf32>
    %221 = vector.shape_cast %216 : vector<128xf32> to vector<1x128xf32>
    %222 = vector.broadcast %221 : vector<1x128xf32> to vector<8x128xf32>
    %223 = arith.mulf %157, %222 : vector<8x128xf32>
    %224 = vector.shape_cast %218 : vector<128xf32> to vector<1x128xf32>
    %225 = vector.broadcast %224 : vector<1x128xf32> to vector<8x128xf32>
    %226 = arith.mulf %160, %225 : vector<8x128xf32>
    %227 = arith.addf %223, %226 : vector<8x128xf32>
    %228 = vector.shape_cast %220 : vector<128xf32> to vector<1x128xf32>
    %229 = vector.broadcast %228 : vector<1x128xf32> to vector<8x128xf32>
    %230 = arith.addf %227, %229 : vector<8x128xf32>
    %cst_20 = arith.constant 0.000000e+00 : f32
    %231 = vector.broadcast %cst_20 : f32 to vector<8x128xf32>
    %232 = arith.maximumf %230, %231 : vector<8x128xf32>
    %233 = vector.extract_strided_slice %1 {offsets = [33, 0], sizes = [1, 128], strides = [1, 1]} : vector<48x128xf32> to vector<1x128xf32>
    %234 = vector.shape_cast %233 : vector<1x128xf32> to vector<128xf32>
    %235 = vector.shape_cast %234 : vector<128xf32> to vector<1x128xf32>
    %236 = vector.broadcast %235 : vector<1x128xf32> to vector<8x128xf32>
    %237 = arith.mulf %178, %236 : vector<8x128xf32>
    %238 = vector.extract_strided_slice %1 {offsets = [34, 0], sizes = [1, 128], strides = [1, 1]} : vector<48x128xf32> to vector<1x128xf32>
    %239 = vector.shape_cast %238 : vector<1x128xf32> to vector<128xf32>
    %240 = vector.shape_cast %239 : vector<128xf32> to vector<1x128xf32>
    %241 = vector.broadcast %240 : vector<1x128xf32> to vector<8x128xf32>
    %242 = arith.mulf %178, %241 : vector<8x128xf32>
    %243 = vector.extract_strided_slice %1 {offsets = [35, 0], sizes = [1, 128], strides = [1, 1]} : vector<48x128xf32> to vector<1x128xf32>
    %244 = vector.shape_cast %243 : vector<1x128xf32> to vector<128xf32>
    %245 = vector.shape_cast %244 : vector<128xf32> to vector<1x128xf32>
    %246 = vector.broadcast %245 : vector<1x128xf32> to vector<8x128xf32>
    %247 = arith.mulf %196, %246 : vector<8x128xf32>
    %248 = arith.addf %237, %247 : vector<8x128xf32>
    %249 = vector.extract_strided_slice %1 {offsets = [36, 0], sizes = [1, 128], strides = [1, 1]} : vector<48x128xf32> to vector<1x128xf32>
    %250 = vector.shape_cast %249 : vector<1x128xf32> to vector<128xf32>
    %251 = vector.shape_cast %250 : vector<128xf32> to vector<1x128xf32>
    %252 = vector.broadcast %251 : vector<1x128xf32> to vector<8x128xf32>
    %253 = arith.mulf %196, %252 : vector<8x128xf32>
    %254 = arith.addf %242, %253 : vector<8x128xf32>
    %255 = vector.extract_strided_slice %1 {offsets = [37, 0], sizes = [1, 128], strides = [1, 1]} : vector<48x128xf32> to vector<1x128xf32>
    %256 = vector.shape_cast %255 : vector<1x128xf32> to vector<128xf32>
    %257 = vector.shape_cast %256 : vector<128xf32> to vector<1x128xf32>
    %258 = vector.broadcast %257 : vector<1x128xf32> to vector<8x128xf32>
    %259 = arith.mulf %214, %258 : vector<8x128xf32>
    %260 = arith.addf %248, %259 : vector<8x128xf32>
    %261 = vector.extract_strided_slice %1 {offsets = [38, 0], sizes = [1, 128], strides = [1, 1]} : vector<48x128xf32> to vector<1x128xf32>
    %262 = vector.shape_cast %261 : vector<1x128xf32> to vector<128xf32>
    %263 = vector.shape_cast %262 : vector<128xf32> to vector<1x128xf32>
    %264 = vector.broadcast %263 : vector<1x128xf32> to vector<8x128xf32>
    %265 = arith.mulf %214, %264 : vector<8x128xf32>
    %266 = arith.addf %254, %265 : vector<8x128xf32>
    %267 = vector.extract_strided_slice %1 {offsets = [39, 0], sizes = [1, 128], strides = [1, 1]} : vector<48x128xf32> to vector<1x128xf32>
    %268 = vector.shape_cast %267 : vector<1x128xf32> to vector<128xf32>
    %269 = vector.shape_cast %268 : vector<128xf32> to vector<1x128xf32>
    %270 = vector.broadcast %269 : vector<1x128xf32> to vector<8x128xf32>
    %271 = arith.mulf %232, %270 : vector<8x128xf32>
    %272 = arith.addf %260, %271 : vector<8x128xf32>
    %273 = vector.extract_strided_slice %1 {offsets = [40, 0], sizes = [1, 128], strides = [1, 1]} : vector<48x128xf32> to vector<1x128xf32>
    %274 = vector.shape_cast %273 : vector<1x128xf32> to vector<128xf32>
    %275 = vector.shape_cast %274 : vector<128xf32> to vector<1x128xf32>
    %276 = vector.broadcast %275 : vector<1x128xf32> to vector<8x128xf32>
    %277 = arith.mulf %232, %276 : vector<8x128xf32>
    %278 = arith.addf %266, %277 : vector<8x128xf32>
    %c1_i32_21 = arith.constant 1 : i32
    %279 = tpu.dynamic_rotate %278 by %c1_i32_21 dim 1 : vector<8x128xf32>, i32 -> vector<8x128xf32>
    %c127_i32_22 = arith.constant 127 : i32
    %280 = tpu.dynamic_rotate %278 by %c127_i32_22 dim 1 : vector<8x128xf32>, i32 -> vector<8x128xf32>
    %281 = arith.select %27, %279, %280 : vector<8x128xi1>, vector<8x128xf32>
    %282 = arith.addf %272, %281 : vector<8x128xf32>
    %283 = vector.extract_strided_slice %1 {offsets = [41, 0], sizes = [1, 128], strides = [1, 1]} : vector<48x128xf32> to vector<1x128xf32>
    %284 = vector.shape_cast %283 : vector<1x128xf32> to vector<128xf32>
    %285 = vector.shape_cast %284 : vector<128xf32> to vector<1x128xf32>
    %286 = vector.broadcast %285 : vector<1x128xf32> to vector<8x128xf32>
    %287 = arith.addf %282, %286 : vector<8x128xf32>
    %c0_23 = arith.constant 0 : index
    %c0_24 = arith.constant 0 : index
    %288 = vector.load %arg4[%c0_23, %c0_24] : memref<8x128xf32, #tpu.memory_space<vmem>>, vector<8x128xf32>
    tpu.vector_store %arg4[%c0_23, %c0_24], %157 {strides = array<i32>} : memref<8x128xf32, #tpu.memory_space<vmem>>, vector<8x128xf32>,
    %c0_25 = arith.constant 0 : index
    %c0_26 = arith.constant 0 : index
    %289 = vector.load %arg3[%c0_25, %c0_26] : memref<8x128xf32, #tpu.memory_space<vmem>>, vector<8x128xf32>
    tpu.vector_store %arg3[%c0_25, %c0_26], %287 {strides = array<i32>} : memref<8x128xf32, #tpu.memory_space<vmem>>, vector<8x128xf32>,
    return
  }
  func.func @transform_0(%arg0: i32) -> (i32, i32) {
    %c0_i32 = arith.constant 0 : i32
    %c0_i32_0 = arith.constant 0 : i32
    return %arg0, %c0_i32 : i32, i32
  }
  func.func @transform_1(%arg0: i32) -> (i32, i32) {
    %c0_i32 = arith.constant 0 : i32
    %c0_i32_0 = arith.constant 0 : i32
    %c0_i32_1 = arith.constant 0 : i32
    return %c0_i32, %c0_i32_0 : i32, i32
  }
  func.func @transform_2(%arg0: i32) -> (i32, i32) {
    %c0_i32 = arith.constant 0 : i32
    %c0_i32_0 = arith.constant 0 : i32
    return %arg0, %c0_i32 : i32, i32
  }
  func.func @transform_3(%arg0: i32) -> (i32, i32) {
    %c0_i32 = arith.constant 0 : i32
    %c0_i32_0 = arith.constant 0 : i32
    return %arg0, %c0_i32 : i32, i32
  }
}

</mosaic_0001>

<bundles_post_ra>
// kernel: autoencoder_forward.1
= control target key start
LH: loop header
LB: loop body
LE: loop exit
PB: predicated region body
PF: predicated region fallthrough
CT: control target
= control target key end

     0   :  { %v20_v0 = vlaneseq  ;;  %s319_s14 = smov 127   ;;  %s320_s15 = smov 1   ;;  %v321_v22 = vmov 0   ;;  %s459_s0 = inlined_call_operand.vmem [shape: f32[8,128], index: 0, kind: input, shape index: {}]   ;;  %s460_s1 = inlined_call_operand.vmem [shape: f32[48,128], index: 1, kind: input, shape index: {}]   ;;  %s461_s3 = inlined_call_operand.vmem [shape: f32[8,128], index: 3, kind: output, shape index: {1}]   ;;  %s462_s2 = inlined_call_operand.vmem [shape: f32[8,128], index: 2, kind: output, shape index: {0}]  }
   0x1   :  { %v13_v1 = vld [vmem:[%s459_s0] sm:$0xff]  ;;  %v15_v13 = vld [vmem:[%s460_s1 + $0x8] sm:$0xff]  ;;  %v392_v50 = vld [vmem:[%s460_s1 + $0x10] sm:$0xff] }
   0x2   :  { %v21_v2 = vand.u32 127, %v20_v0  ;;  %48 = vrot.lane.b32.xlu1 %v13_v1, %s319_s14  ;;  %v42_v6 = vshrl.u32 %v20_v0, 7  ;;  %v14_v8 = vld [vmem:[%s460_s1] sm:$0xff] }
   0x4   :  { %37 = vrot.lane.b32.xlu0 %v21_v2, %s320_s15  ;;  %v27_v3 = vand.u32 1, %v21_v2  ;;  %v22_v4 = vadd.s32 1, %v21_v2  ;;  %v351_v9 = vsub.s32 1, %v42_v6  ;;  %v353_v10 = vsub.s32 3, %v42_v6 }
   0x5   :  { %v355_v11 = vsub.s32 6, %v42_v6  ;;  %v357_v12 = vsub.s32 0, %v42_v6  ;;  %v362_v14 = vsub.s32 2, %v42_v6  ;;  %v364_v15 = vsub.s32 4, %v42_v6 }
   0x6   :  { %v35_v5 = vmul.u32 2, %v27_v3  ;;  %v366_v16 = vsub.s32 7, %v42_v6  ;;  %v71_v19 = vrot.slane %v14_v8, %v353_v10  ;;  %v105_v21 = vrot.slane %v15_v13, %v351_v9 }
   0x7   :  { %v54_v18 = vrot.slane %v14_v8, %v357_v12  ;;  %v88_v20 = vrot.slane %v14_v8, %v355_v11  ;;  %v59_v24 = vrot.slane %v14_v8, %v351_v9  ;;  %v373_v25 = vsub.s32 5, %v42_v6 }
   0x8   :  { %46 = vrot.lane.b32.xlu0 %v13_v1, %s320_s15  ;;  %v36_v7 = vsub.s32 %v22_v4, %v35_v5  ;;  %v76_v28 = vrot.slane %v14_v8, %v364_v15  ;;  %v93_v29 = vrot.slane %v14_v8, %v366_v16  ;;  %v110_v30 = vrot.slane %v15_v13, %v362_v14 }
   0x9   :  { %v65_v31 = vrot.slane %v14_v8, %v362_v14  ;;  %v55_v33 = vmul.f32 %v54_v18, %v13_v1  ;;  %v72_v35 = vmul.f32 %v71_v19, %v13_v1  ;;  %v89_v36 = vmul.f32 %v88_v20, %v13_v1 }
   0xa   :  { %v106_v37 = vmul.f32 %v105_v21, %v13_v1  ;;  %v82_v38 = vrot.slane %v14_v8, %v373_v25  ;;  %v99_v39 = vrot.slane %v15_v13, %v357_v12  ;;  %v116_v41 = vrot.slane %v15_v13, %v353_v10 }
   0xb   :  { %v127_v51 = vrot.slane %v15_v13, %v373_v25  ;;  %v138_v52 = vrot.slane %v15_v13, %v366_v16  ;;  %v122_v57 = vrot.slane %v15_v13, %v364_v15  ;;  %v132_v58 = vrot.slane %v15_v13, %v355_v11 }
   0xc   :  { %v150_v62 = vrot.slane %v392_v50, %v351_v9  ;;  %v144_v63 = vrot.slane %v392_v50, %v357_v12  ;;  %v162_v3 = vrot.slane %v392_v50, %v353_v10  ;;  %v156_v5 = vrot.slane %v392_v50, %v362_v14 }
  0x74   :  { %v49_v27 = vpop.permute.xlu1 %48 }
  0x76   :  { %v38_v17 = vpop.permute.xlu0 %37 }
  0x77   :  { %vm39_vm0 = vcmp.eq.s32.totalorder %v38_v17, %v36_v7 }
  0x78   :  { %v40_v23 = vsel %vm39_vm0, 1, %v321_v22 }
  0x79   :  { %v44_v26 = vrot.slane %v40_v23, %v357_v12 }
  0x7a   :  { %v47_v32 = vpop.permute.xlu0 %46 }
  0x7b   :  { %vm380_vm1 = vcmp.eq.s32.totalorder %v44_v26, 1  ;;  %v174_v26 = vrot.slane %v392_v50, %v364_v15 }
  0x7c   :  { %v50_v40 = vsel %vm380_vm1, %v47_v32, %v49_v27  ;;  %v184_v32 = vrot.slane %v392_v50, %v373_v25 }
  0x7d   :  { %v60_v42 = vmul.f32 %v59_v24, %v50_v40  ;;  %v77_v43 = vmul.f32 %v76_v28, %v50_v40  ;;  %v94_v44 = vmul.f32 %v93_v29, %v50_v40  ;;  %v111_v45 = vmul.f32 %v110_v30, %v50_v40 }
  0x7f   :  { %v61_v46 = vadd.f32 %v60_v42, %v55_v33  ;;  %v78_v47 = vadd.f32 %v77_v43, %v72_v35  ;;  %v95_v48 = vadd.f32 %v94_v44, %v89_v36  ;;  %v112_v49 = vadd.f32 %v111_v45, %v106_v37  ;;  %v18_v37 = vld [vmem:[%s460_s1 + $0x20] sm:$0xff] }
  0x80   :  { %v195_v42 = vrot.slane %v392_v50, %v366_v16 }
  0x81   :  { %v66_v53 = vadd.f32 %v65_v31, %v61_v46  ;;  %v83_v54 = vadd.f32 %v82_v38, %v78_v47  ;;  %v100_v55 = vadd.f32 %v99_v39, %v95_v48  ;;  %v117_v56 = vadd.f32 %v116_v41, %v112_v49  ;;  %v17_v31 = vld [vmem:[%s460_s1 + $0x18] sm:$0xff] }
  0x82   :  { %v201_v33 = vrot.slane %v17_v31, %v357_v12  ;;  %v218_v35 = vrot.slane %v17_v31, %v353_v10  ;;  %v235_v36 = vrot.slane %v17_v31, %v355_v11  ;;  %v189_v38 = vrot.slane %v392_v50, %v355_v11 }
  0x83   :  { %v67_v59 = vmax.f32 %v66_v53, 0.0  ;;  %v84_v60 = vmax.f32 %v83_v54, 0.0  ;;  %v101_v61 = vmax.f32 %v100_v55, 0.0  ;;  %v118_v0 = vmax.f32 %v117_v56, 0.0 }
  0x84   :  { %v206_v39 = vrot.slane %v17_v31, %v351_v9  ;;  %v223_v40 = vrot.slane %v17_v31, %v364_v15  ;;  %v240_v41 = vrot.slane %v17_v31, %v366_v16  ;;  %v212_v44 = vrot.slane %v17_v31, %v362_v14 }
  0x85   :  { %v128_v1 = vmul.f32 %v127_v51, %v67_v59  ;;  %v139_v2 = vmul.f32 %v138_v52, %v84_v60  ;;  %v133_v4 = vmul.f32 %v132_v58, %v84_v60  ;;  %v123_v6 = vmul.f32 %v122_v57, %v67_v59 }
  0x86   :  { %v151_v8 = vmul.f32 %v150_v62, %v101_v61  ;;  %v145_v13 = vmul.f32 %v144_v63, %v101_v61  ;;  %v163_v19 = vmul.f32 %v162_v3, %v118_v0  ;;  %v157_v20 = vmul.f32 %v156_v5, %v118_v0 }
  0x87   :  { %v140_v7 = vadd.f32 %v139_v2, %v128_v1  ;;  %v134_v17 = vadd.f32 %v133_v4, %v123_v6  ;;  %v229_v45 = vrot.slane %v17_v31, %v373_v25  ;;  %v246_v48 = vrot.slane %v18_v37, %v357_v12  ;;  %v19_v4 = vld [vmem:[%s460_s1 + $0x28] sm:$0xff] }
  0x88   :  { %v257_v61 = vrot.slane %v18_v37, %v362_v14  ;;  %v268_v62 = vrot.slane %v18_v37, %v364_v15  ;;  %v280_v63 = vrot.slane %v18_v37, %v355_v11  ;;  %v252_v5 = vrot.slane %v18_v37, %v351_v9 }
  0x89   :  { %v152_v18 = vadd.f32 %v151_v8, %v140_v7  ;;  %v146_v21 = vadd.f32 %v145_v13, %v134_v17  ;;  %v262_v6 = vrot.slane %v18_v37, %v353_v10  ;;  %v274_v7 = vrot.slane %v18_v37, %v373_v25 }
  0x8a   :  { %v286_v14 = vrot.slane %v18_v37, %v366_v16  ;;  %v304_v31 = vrot.slane %v19_v4, %v351_v9 }
  0x8b   :  { %v164_v22 = vadd.f32 %v163_v19, %v152_v18  ;;  %v158_v23 = vadd.f32 %v157_v20, %v146_v21  ;;  %v292_v19 = vrot.slane %v19_v4, %v357_v12 }
  0x8d   :  { %167 = vrot.lane.b32.xlu0 %v164_v22, %s319_s14  ;;  %165 = vrot.lane.b32.xlu1 %v164_v22, %s320_s15 }
  0xff   :  { %v168_v24 = vpop.permute.xlu0 %167  ;;  %v166_v27 = vpop.permute.xlu1 %165 }
 0x100   :  { %v169_v28 = vsel %vm380_vm1, %v166_v27, %v168_v24 }
 0x101   :  { %v170_v29 = vadd.f32 %v169_v28, %v158_v23 }
 0x103   :  { %v175_v30 = vadd.f32 %v174_v26, %v170_v29 }
 0x105   :  { %306 = vst [vmem:[%s461_s3] sm:$0xff] %v175_v30  ;;  %178 = vrot.lane.b32.xlu0 %v175_v30, %s319_s14  ;;  %176 = vrot.lane.b32.xlu1 %v175_v30, %s320_s15  ;;  %v185_v47 = vmul.f32 %v184_v32, %v175_v30  ;;  %v202_v51 = vmul.f32 %v201_v33, %v175_v30 }
 0x106   :  { %v219_v52 = vmul.f32 %v218_v35, %v175_v30  ;;  %v236_v53 = vmul.f32 %v235_v36, %v175_v30 }
 0x177   :  { %v179_v43 = vpop.permute.xlu0 %178  ;;  %v177_v46 = vpop.permute.xlu1 %176 }
 0x178   :  { %v180_v49 = vsel %vm380_vm1, %v177_v46, %v179_v43 }
 0x179   :  { %v190_v54 = vmul.f32 %v189_v38, %v180_v49  ;;  %v207_v55 = vmul.f32 %v206_v39, %v180_v49  ;;  %v224_v56 = vmul.f32 %v223_v40, %v180_v49  ;;  %v241_v57 = vmul.f32 %v240_v41, %v180_v49 }
 0x17b   :  { %v191_v50 = vadd.f32 %v190_v54, %v185_v47  ;;  %v208_v58 = vadd.f32 %v207_v55, %v202_v51  ;;  %v225_v59 = vadd.f32 %v224_v56, %v219_v52  ;;  %v242_v60 = vadd.f32 %v241_v57, %v236_v53 }
 0x17d   :  { %v196_v0 = vadd.f32 %v195_v42, %v191_v50  ;;  %v213_v1 = vadd.f32 %v212_v44, %v208_v58  ;;  %v230_v2 = vadd.f32 %v229_v45, %v225_v59  ;;  %v247_v3 = vadd.f32 %v246_v48, %v242_v60 }
 0x17f   :  { %v197_v8 = vmax.f32 %v196_v0, 0.0  ;;  %v214_v15 = vmax.f32 %v213_v1, 0.0  ;;  %v231_v13 = vmax.f32 %v230_v2, 0.0  ;;  %v248_v11 = vmax.f32 %v247_v3, 0.0 }
 0x181   :  { %v258_v17 = vmul.f32 %v257_v61, %v197_v8  ;;  %v269_v18 = vmul.f32 %v268_v62, %v214_v15  ;;  %v263_v20 = vmul.f32 %v262_v6, %v214_v15  ;;  %v275_v21 = vmul.f32 %v274_v7, %v231_v13 }
 0x182   :  { %v287_v22 = vmul.f32 %v286_v14, %v248_v11  ;;  %v253_v23 = vmul.f32 %v252_v5, %v197_v8  ;;  %v281_v26 = vmul.f32 %v280_v63, %v231_v13  ;;  %v293_v28 = vmul.f32 %v292_v19, %v248_v11 }
 0x183   :  { %v270_v24 = vadd.f32 %v269_v18, %v258_v17 }
 0x184   :  { %v264_v27 = vadd.f32 %v263_v20, %v253_v23 }
 0x185   :  { %v282_v10 = vadd.f32 %v281_v26, %v270_v24 }
 0x186   :  { %v276_v25 = vadd.f32 %v275_v21, %v264_v27 }
 0x187   :  { %v294_v29 = vadd.f32 %v293_v28, %v282_v10 }
 0x188   :  { %v288_v16 = vadd.f32 %v287_v22, %v276_v25 }
 0x189   :  { %297 = vrot.lane.b32.xlu0 %v294_v29, %s319_s14  ;;  %295 = vrot.lane.b32.xlu1 %v294_v29, %s320_s15 }
 0x1fb   :  { %v298_v30 = vpop.permute.xlu0 %297  ;;  %v296_v12 = vpop.permute.xlu1 %295 }
 0x1fc   :  { %v299_v32 = vsel %vm380_vm1, %v296_v12, %v298_v30 }
 0x1fd   :  { %v300_v33 = vadd.f32 %v299_v32, %v288_v16 }
 0x1ff   :  { %v305_v35 = vadd.f32 %v304_v31, %v300_v33 }
 0x201   :  { %307 = vst [vmem:[%s462_s2] sm:$0xff] %v305_v35 }

</bundles_post_ra>
